<compile_context>
chip_gen: v5e
topology: v5e:2x2
jax: 0.10.0
libtpu: 0.0.40
codegen_flags: <defaults>
</compile_context>

<pallas_src>
import functools

import jax
import jax.numpy as jnp
from jax import lax
from jax.experimental import pallas as pl
from jax.experimental.pallas import tpu as pltpu


def _estimator_kernel(f_ref, y_ref, ave_ref, cov_ref, amt_ref, w_ref, ratio_ref,
                      ave_out, cov_out, amt_out, m_out, *scratch, binary_labels):
    """Grid over N tiles.  Outputs double as accumulators:
       ave_out <- sum_n y*f, cov_out <- sum_n y^2*f^2, amt_out <- sum_n y.
       The last step finalizes the EstimatorCV update and M=(ratio/2)*Cov'(W^2)^T."""
    i = pl.program_id(0)

    @pl.when(i == 0)
    def _init():
        ave_out[...] = jnp.zeros_like(ave_out)
        cov_out[...] = jnp.zeros_like(cov_out)
        amt_out[...] = jnp.zeros_like(amt_out)
        m_out[...] = jnp.zeros_like(m_out)
        if not binary_labels:
            scratch[0][...] = jnp.zeros_like(scratch[0])
            scratch[1][...] = jnp.zeros_like(scratch[1])

    f = f_ref[...]                      # (TN, A)
    yt = y_ref[...].T                   # (C, TN) in-kernel transpose (no extra HBM input)

    ave_out[...] += jnp.dot(yt, f, preferred_element_type=jnp.float32)   # sum_n y*f
    amt_out[...] += jnp.sum(yt, axis=1, keepdims=True)                   # sum_n y   (C,1)
    if binary_labels:
        # y in {0,1} => y^2 == y: one of the three N-contraction matmuls is dropped
        # and t_f == sum_fy, s_y2 == sum_y.
        cov_out[...] += jnp.dot(yt, f * f, preferred_element_type=jnp.float32)
    else:
        y2t = yt * yt
        cov_out[...] += jnp.dot(y2t, f * f, preferred_element_type=jnp.float32)
        scratch[0][...] += jnp.dot(y2t, f, preferred_element_type=jnp.float32)
        scratch[1][...] += jnp.sum(y2t, axis=1, keepdims=True)

    @pl.when(i == pl.num_programs(0) - 1)
    def _finalize():
        sum_fy = ave_out[...]           # (C, A)
        t_f2 = cov_out[...]             # (C, A)
        sum_y = amt_out[...]            # (C, 1)
        if binary_labels:
            t_f, s_y2 = sum_fy, sum_y
        else:
            t_f, s_y2 = scratch[0][...], scratch[1][...]

        ave = ave_ref[...]
        cov = cov_ref[...]
        amt = amt_ref[...]

        # Amount guard (classes with no positives divide by 1) via EUP reciprocal
        # instead of two (C,A) divides.
        inv_amt = pl.reciprocal(jnp.maximum(sum_y, 1.0), approx=False)   # (C, 1)
        ave_cxa = sum_fy * inv_amt                                       # (C, A)
        # sum_n (y*f - y*ave)^2 in expanded form so the N-contraction ran on the MXU.
        var_num = t_f2 - 2.0 * ave_cxa * t_f + ave_cxa * ave_cxa * s_y2
        var_temp = var_num * inv_amt

        denom = sum_y + amt
        w_cv = sum_y * pl.reciprocal(jnp.where(denom == 0.0, 1.0, denom),
                                     approx=False)                       # 0/0 -> 0
        one_m = 1.0 - w_cv
        diff = ave - ave_cxa
        cov_new = cov * one_m + var_temp * w_cv + (w_cv * one_m) * diff * diff
        ave_out[...] = ave * one_m + ave_cxa * w_cv
        cov_out[...] = cov_new
        amt_out[...] = amt + sum_y

        # M[c', c] = (ratio/2) * sum_a Cov'[c', a] * W[c, a]^2 : contract A once here
        # so the aug phase only does a (TN,C)x(C,C) matmul per tile.
        w = w_ref[...]
        m_out[...] = lax.dot_general(
            cov_new, w * w, (((1,), (1,)), ((), ())),
            preferred_element_type=jnp.float32) * (ratio_ref[0, 0] * 0.5)


def _aug_loss_kernel(y_ref, lg_ref, amt_row_ref, m_ref, rowsum_ref, *, var_type):
    """Per N tile: ISDA augmentation + BCE-with-logits row sums."""
    y = y_ref[...]                       # (TN, C)
    lg = lg_ref[...]                     # (TN, C)
    amt_row = amt_row_ref[...]           # (1, C) lane-dense per-class Amount'

    # pos_label_num = labels * Amount' as a plain broadcast (no diag matmul).
    pos_label_num = y * amt_row                                        # (TN, C)
    pos_label_amount = jnp.sum(pos_label_num, axis=1, keepdims=True)   # (TN, 1)
    if var_type == "weighted-var":
        coef = pos_label_num * pl.reciprocal(
            jnp.maximum(pos_label_amount, 1.0), approx=False)
    elif var_type == "inverted-weighted-var":
        coef = y * pl.reciprocal(jnp.maximum(pos_label_num, 1.0),
                                 approx=False) * pos_label_amount
    else:
        raise ValueError(f"unknown var_type: {var_type}")

    # ratio/2 already folded into M in phase 1.
    sigma2 = jnp.dot(coef, m_ref[...], preferred_element_type=jnp.float32)  # (TN, C)
    aug = lg + sigma2 * (1.0 - 2.0 * y)

    # BCEWithLogits, numerically stable form.  log(1+z) with z = exp(-|aug|) in (0,1];
    # absolute error vs log1p is < ~1e-7 and vanishes in the mean reduction.
    bce = jnp.maximum(aug, 0.0) - aug * y + jnp.log(1.0 + jnp.exp(-jnp.abs(aug)))
    rowsum_ref[...] = jnp.sum(bce, axis=1, keepdims=True)


def _f32_bytes(*shapes):
    total = 0
    for s in shapes:
        n = 1
        for d in s:
            n *= d
        total += 4 * n
    return total


def _vmem_limit(nbytes):
    # Explicit scoped-VMEM limit sized from the buffer sum; capped for v7x (64 MiB).
    return int(min(max(2 * nbytes, 32 * 1024 * 1024), 64 * 1024 * 1024))


def isda_bce_forward(output, features, target, fc_weight, ave, cov, amount,
                     ratio, *, var_type, binary_labels=True, block_n=256):
    """Functional ISDA_BCELoss.forward.  Returns (loss, (Ave', CoVariance', Amount')).

    binary_labels=True assumes target is strictly {0,1} multi-hot (drops one of the
    three N-contraction matmuls in the estimator); pass False for soft labels.
    """
    f32 = jnp.float32
    N, A = features.shape
    C = target.shape[1]
    assert output.shape == (N, C) and fc_weight.shape == (C, A)

    features = features.astype(f32)
    target = target.astype(f32)
    output = output.astype(f32)
    fc_weight = fc_weight.astype(f32)
    ave = ave.astype(f32).reshape(C, A)
    cov = cov.astype(f32).reshape(C, A)
    amount_col = amount.astype(f32).reshape(C, 1)
    ratio_arr = jnp.full((1, 1), ratio, f32)

    # --- N tiling: pad to a multiple of an 8-aligned tile.  Zero-padded rows are
    # exact no-ops for the estimator contractions; their BCE rows are sliced off
    # before the mean.
    tn = block_n if N > block_n else ((N + 7) // 8) * 8
    tn = max(8, (tn // 8) * 8)
    n_pad = ((N + tn - 1) // tn) * tn
    if n_pad != N:
        pad = ((0, n_pad - N), (0, 0))
        features = jnp.pad(features, pad)
        target = jnp.pad(target, pad)
        output = jnp.pad(output, pad)
    n_tiles = n_pad // tn

    smem11 = pl.BlockSpec((1, 1), lambda i: (0, 0),
                          memory_space=pltpu.MemorySpace.SMEM)
    full_ca = pl.BlockSpec((C, A), lambda i: (0, 0))
    full_c1 = pl.BlockSpec((C, 1), lambda i: (0, 0))

    # ---------------- phase 1: EstimatorCV.update_CV (+ scaled Cov'(W^2)^T) -------
    scratch1 = [] if binary_labels else [pltpu.VMEM((C, A), f32),
                                         pltpu.VMEM((C, 1), f32)]
    est_bytes = (2 * _f32_bytes((tn, A), (tn, C))                      # tiles x2 buf
                 + 2 * _f32_bytes((C, A), (C, A), (C, 1), (C, A))      # state + W in
                 + 2 * _f32_bytes((C, A), (C, A), (C, 1), (C, C))      # outputs
                 + (0 if binary_labels else _f32_bytes((C, A), (C, 1))))
    est_kernel = functools.partial(_estimator_kernel, binary_labels=binary_labels)
    ave_n, cov_n, amt_n, m_scaled = pl.pallas_call(
        est_kernel,
        out_shape=(jax.ShapeDtypeStruct((C, A), f32),    # Ave'
                   jax.ShapeDtypeStruct((C, A), f32),    # CoVariance'
                   jax.ShapeDtypeStruct((C, 1), f32),    # Amount'
                   jax.ShapeDtypeStruct((C, C), f32)),   # (ratio/2) Cov'(W^2)^T
        grid_spec=pltpu.PrefetchScalarGridSpec(
            num_scalar_prefetch=0,
            grid=(n_tiles,),
            in_specs=[pl.BlockSpec((tn, A), lambda i: (i, 0)),   # features tile
                      pl.BlockSpec((tn, C), lambda i: (i, 0)),   # target tile
                      full_ca,                                   # Ave
                      full_ca,                                   # CoVariance
                      full_c1,                                   # Amount
                      full_ca,                                   # fc weight
                      smem11],                                   # ratio
            out_specs=(full_ca, full_ca, full_c1,
                       pl.BlockSpec((C, C), lambda i: (0, 0))),
            scratch_shapes=scratch1),
        compiler_params=pltpu.CompilerParams(
            dimension_semantics=("arbitrary",),          # N is a reduction axis here
            vmem_limit_bytes=_vmem_limit(est_bytes)),
    )(features, target, ave, cov, amount_col, fc_weight, ratio_arr)

    # ---------------- phase 2: isda_aug + BCEWithLogits ----------------
    amt_row = amt_n.reshape(1, C)        # lane-dense per-class Amount' for y * Amount'
    aug_bytes = (2 * _f32_bytes((tn, C), (tn, C), (1, C), (C, C))
                 + 2 * _f32_bytes((tn, 1)))
    aug_kernel = functools.partial(_aug_loss_kernel, var_type=var_type)
    row_sums = pl.pallas_call(
        aug_kernel,
        out_shape=jax.ShapeDtypeStruct((n_pad, 1), f32),
        grid_spec=pltpu.PrefetchScalarGridSpec(
            num_scalar_prefetch=0,
            grid=(n_tiles,),
            in_specs=[pl.BlockSpec((tn, C), lambda i: (i, 0)),   # target tile
                      pl.BlockSpec((tn, C), lambda i: (i, 0)),   # logits tile
                      pl.BlockSpec((1, C), lambda i: (0, 0)),    # Amount' row
                      pl.BlockSpec((C, C), lambda i: (0, 0))],   # scaled Cov'(W^2)^T
            out_specs=pl.BlockSpec((tn, 1), lambda i: (i, 0))),
        compiler_params=pltpu.CompilerParams(
            dimension_semantics=("parallel",),           # independent per N tile
            vmem_limit_bytes=_vmem_limit(aug_bytes)),
    )(target, output, amt_row, m_scaled)

    loss = jnp.sum(row_sums[:N, 0]) / jnp.float32(N * C)
    return loss, (ave_n, cov_n, amt_n)


isda_bce_forward_jit = jax.jit(
    isda_bce_forward, static_argnames=("var_type", "binary_labels", "block_n"))


def _reference(output, features, target, fc_weight, ave, cov, amount, ratio, var_type):
    """Pure-JAX mirror of the PyTorch code (for verification only)."""
    N, A = features.shape
    C = target.shape[1]
    labels = target
    fbs = features[:, None, :] * labels[:, :, None]
    amount_cxa = jnp.broadcast_to(jnp.sum(labels, axis=0)[:, None], (C, A))
    amount_cxa = jnp.where(amount_cxa == 0, 1.0, amount_cxa)
    ave_cxa = jnp.sum(fbs, axis=0) / amount_cxa
    var_temp = fbs - ave_cxa[None] * labels[:, :, None]
    var_temp = jnp.sum(var_temp ** 2, axis=0) / amount_cxa
    sum_w = jnp.sum(labels, axis=0)
    amount0 = amount[:, 0]
    w_cv = sum_w / (sum_w + amount0)
    w_cv = jnp.where(jnp.isnan(w_cv), 0.0, w_cv)
    additional = (w_cv * (1 - w_cv))[:, None] * (ave - ave_cxa) ** 2
    cov_new = cov * (1 - w_cv)[:, None] + var_temp * w_cv[:, None] + additional
    ave_new = ave * (1 - w_cv)[:, None] + ave_cxa * w_cv[:, None]
    amt_new = amount0 + sum_w

    pos_label_num = labels * amt_new[None, :]
    pos_label_amount = jnp.sum(pos_label_num, axis=1, keepdims=True)
    if var_type == "weighted-var":
        sel = (cov_new[None] * pos_label_num[:, :, None]
               / jnp.maximum(pos_label_amount, 1.0)[:, :, None])
    else:
        sel = (cov_new[None] * labels[:, :, None]
               / jnp.maximum(pos_label_num, 1.0)[:, :, None]
               * pos_label_amount[:, :, None])
    fused = jnp.sum(sel, axis=1)
    sigma2 = jnp.sum((fc_weight ** 2)[None] * fused[:, None, :], axis=2) * ratio * 0.5
    aug = output + sigma2 * (1 - 2 * labels)
    bce = jnp.maximum(aug, 0.0) - aug * labels + jnp.log1p(jnp.exp(-jnp.abs(aug)))
    return jnp.mean(bce), (ave_new, cov_new, amt_new[:, None])


if __name__ == "__main__":
    N, A, C = 40, 32, 8   # batch, feature_num, class_num (small test shapes)
    key = jax.random.PRNGKey(0)
    k1, k2, k3, k4, k5, k6, k7 = jax.random.split(key, 7)

    features = jax.random.normal(k1, (N, A), jnp.float32)
    target = (jax.random.uniform(k2, (N, C)) < 0.5).astype(jnp.float32)
    target = target.at[:, 0].set(0.0)            # a class with no positive labels
    logits = jax.random.normal(k3, (N, C), jnp.float32)
    bound = 1.0 / (A ** 0.5)
    fc_weight = jax.random.uniform(k4, (C, A), jnp.float32, -bound, bound)

    # Non-trivial EstimatorCV state; class 0 untouched (Amount[0] = 0 -> 0/0 path).
    ave0 = 0.1 * jax.random.normal(k5, (C, A), jnp.float32)
    cov0 = jnp.abs(0.1 * jax.random.normal(k6, (C, A), jnp.float32))
    amt0 = jnp.floor(4.0 * jax.random.uniform(k7, (C, 1), jnp.float32))
    amt0 = amt0.at[0, 0].set(0.0)
    ratio = 0.5

    ok = True
    for var_type in ("weighted-var", "inverted-weighted-var"):
        # single-tile path and multi-tile (padded) path; binary and general variance
        for block_n, binary in ((256, True), (16, False)):
            loss, (ave_n, cov_n, amt_n) = isda_bce_forward_jit(
                logits, features, target, fc_weight, ave0, cov0, amt0, ratio,
                var_type=var_type, binary_labels=binary, block_n=block_n)
            jax.block_until_ready((loss, ave_n, cov_n, amt_n))

            loss_r, (ave_r, cov_r, amt_r) = _reference(
                logits, features, target, fc_weight, ave0, cov0, amt0, ratio, var_type)
            for got, want in ((loss, loss_r), (ave_n, ave_r),
                              (cov_n, cov_r), (amt_n, amt_r)):
                ok &= bool(jnp.allclose(got, want, rtol=1e-4, atol=1e-4))

    print("KERNEL_OK" if ok else "MISMATCH")
</pallas_src>

<mosaic_0001>
module attributes {stable_mosaic.version = 11 : i64} {
  func.func @_estimator_kernel(%arg0: i32, %arg1: memref<40x32xf32, #tpu.memory_space<vmem>>, %arg2: memref<40x8xf32, #tpu.memory_space<vmem>>, %arg3: memref<8x32xf32, #tpu.memory_space<vmem>>, %arg4: memref<8x32xf32, #tpu.memory_space<vmem>>, %arg5: memref<8x1xf32, #tpu.memory_space<vmem>>, %arg6: memref<8x32xf32, #tpu.memory_space<vmem>>, %arg7: memref<1x1xf32, #tpu.memory_space<smem>>, %arg8: memref<8x32xf32, #tpu.memory_space<vmem>>, %arg9: memref<8x32xf32, #tpu.memory_space<vmem>>, %arg10: memref<8x1xf32, #tpu.memory_space<vmem>>, %arg11: memref<8x8xf32, #tpu.memory_space<vmem>>) attributes {dimension_semantics = [#tpu.dimension_semantics<arbitrary>], iteration_bounds = array<i64: 1>, scalar_prefetch = 0 : i64, scratch_operands = 0 : i64, tpu.core_type = #tpu.core_type<tc>, window_params = [{transform_indices = @transform_0, window_bounds = array<i64: 40, 32>}, {transform_indices = @transform_1, window_bounds = array<i64: 40, 8>}, {pipeline_mode = #tpu.pipeline_mode<synchronous>, transform_indices = @transform_2, window_bounds = array<i64: 8, 32>}, {pipeline_mode = #tpu.pipeline_mode<synchronous>, transform_indices = @transform_3, window_bounds = array<i64: 8, 32>}, {pipeline_mode = #tpu.pipeline_mode<synchronous>, transform_indices = @transform_4, window_bounds = array<i64: 8, 1>}, {pipeline_mode = #tpu.pipeline_mode<synchronous>, transform_indices = @transform_5, window_bounds = array<i64: 8, 32>}, {transform_indices = @transform_6, window_bounds = array<i64: 1, 1>}, {pipeline_mode = #tpu.pipeline_mode<synchronous>, transform_indices = @transform_7, window_bounds = array<i64: 8, 32>}, {pipeline_mode = #tpu.pipeline_mode<synchronous>, transform_indices = @transform_8, window_bounds = array<i64: 8, 32>}, {pipeline_mode = #tpu.pipeline_mode<synchronous>, transform_indices = @transform_9, window_bounds = array<i64: 8, 1>}, {pipeline_mode = #tpu.pipeline_mode<synchronous>, transform_indices = @transform_10, window_bounds = array<i64: 8, 8>}]} {
    %c0_i32 = arith.constant 0 : i32
    %0 = arith.cmpi eq, %arg0, %c0_i32 : i32
    %1 = arith.extui %0 : i1 to i32
    %c0_i32_0 = arith.constant 0 : i32
    %2 = arith.cmpi ne, %1, %c0_i32_0 : i32
    scf.if %2 {
      %cst_20 = arith.constant 0.000000e+00 : f32
      %23 = vector.broadcast %cst_20 : f32 to vector<8x32xf32>
      %c0_21 = arith.constant 0 : index
      %c0_22 = arith.constant 0 : index
      %24 = vector.load %arg8[%c0_21, %c0_22] : memref<8x32xf32, #tpu.memory_space<vmem>>, vector<8x32xf32>
      tpu.vector_store %arg8[%c0_21, %c0_22], %23 {strides = array<i32>} : memref<8x32xf32, #tpu.memory_space<vmem>>, vector<8x32xf32>,
      %cst_23 = arith.constant 0.000000e+00 : f32
      %25 = vector.broadcast %cst_23 : f32 to vector<8x32xf32>
      %c0_24 = arith.constant 0 : index
      %c0_25 = arith.constant 0 : index
      %26 = vector.load %arg9[%c0_24, %c0_25] : memref<8x32xf32, #tpu.memory_space<vmem>>, vector<8x32xf32>
      tpu.vector_store %arg9[%c0_24, %c0_25], %25 {strides = array<i32>} : memref<8x32xf32, #tpu.memory_space<vmem>>, vector<8x32xf32>,
      %cst_26 = arith.constant 0.000000e+00 : f32
      %27 = vector.broadcast %cst_26 : f32 to vector<8x1xf32>
      %c0_27 = arith.constant 0 : index
      %c0_28 = arith.constant 0 : index
      %28 = vector.load %arg10[%c0_27, %c0_28] : memref<8x1xf32, #tpu.memory_space<vmem>>, vector<8x1xf32>
      tpu.vector_store %arg10[%c0_27, %c0_28], %27 {strides = array<i32>} : memref<8x1xf32, #tpu.memory_space<vmem>>, vector<8x1xf32>,
      %cst_29 = arith.constant 0.000000e+00 : f32
      %29 = vector.broadcast %cst_29 : f32 to vector<8x8xf32>
      %c0_30 = arith.constant 0 : index
      %c0_31 = arith.constant 0 : index
      %30 = vector.load %arg11[%c0_30, %c0_31] : memref<8x8xf32, #tpu.memory_space<vmem>>, vector<8x8xf32>
      tpu.vector_store %arg11[%c0_30, %c0_31], %29 {strides = array<i32>} : memref<8x8xf32, #tpu.memory_space<vmem>>, vector<8x8xf32>,
    } else {
    }
    %c0 = arith.constant 0 : index
    %c0_1 = arith.constant 0 : index
    %3 = vector.load %arg1[%c0, %c0_1] : memref<40x32xf32, #tpu.memory_space<vmem>>, vector<40x32xf32>
    %c0_2 = arith.constant 0 : index
    %c0_3 = arith.constant 0 : index
    %4 = vector.load %arg2[%c0_2, %c0_3] : memref<40x8xf32, #tpu.memory_space<vmem>>, vector<40x8xf32>
    %5 = tpu.transpose %4, [1, 0] : vector<40x8xf32> -> vector<8x40xf32>
    %c0_4 = arith.constant 0 : index
    %c0_5 = arith.constant 0 : index
    %6 = vector.load %arg8[%c0_4, %c0_5] : memref<8x32xf32, #tpu.memory_space<vmem>>, vector<8x32xf32>
    %cst = arith.constant dense<0.000000e+00> : vector<8x32xf32>
    %7 = tpu.matmul %5, %3, %cst {dimension_numbers = #tpu.dot_dimension_numbers<[1], [0], [0], [1], [0, 0, 1, 1], [], []>} : vector<8x40xf32>, vector<40x32xf32>, vector<8x32xf32> -> vector<8x32xf32>
    %8 = arith.addf %6, %7 : vector<8x32xf32>
    %c0_6 = arith.constant 0 : index
    %c0_7 = arith.constant 0 : index
    %9 = vector.load %arg8[%c0_6, %c0_7] : memref<8x32xf32, #tpu.memory_space<vmem>>, vector<8x32xf32>
    tpu.vector_store %arg8[%c0_6, %c0_7], %8 {strides = array<i32>} : memref<8x32xf32, #tpu.memory_space<vmem>>, vector<8x32xf32>,
    %c0_8 = arith.constant 0 : index
    %c0_9 = arith.constant 0 : index
    %10 = vector.load %arg10[%c0_8, %c0_9] : memref<8x1xf32, #tpu.memory_space<vmem>>, vector<8x1xf32>
    %cst_10 = arith.constant dense<0.000000e+00> : vector<8xf32>
    %11 = vector.multi_reduction <add>, %5, %cst_10 [1] : vector<8x40xf32> to vector<8xf32>
    %12 = vector.shape_cast %11 : vector<8xf32> to vector<8x1xf32>
    %13 = arith.addf %10, %12 : vector<8x1xf32>
    %c0_11 = arith.constant 0 : index
    %c0_12 = arith.constant 0 : index
    %14 = vector.load %arg10[%c0_11, %c0_12] : memref<8x1xf32, #tpu.memory_space<vmem>>, vector<8x1xf32>
    tpu.vector_store %arg10[%c0_11, %c0_12], %13 {strides = array<i32>} : memref<8x1xf32, #tpu.memory_space<vmem>>, vector<8x1xf32>,
    %c0_13 = arith.constant 0 : index
    %c0_14 = arith.constant 0 : index
    %15 = vector.load %arg9[%c0_13, %c0_14] : memref<8x32xf32, #tpu.memory_space<vmem>>, vector<8x32xf32>
    %16 = arith.mulf %3, %3 : vector<40x32xf32>
    %cst_15 = arith.constant dense<0.000000e+00> : vector<8x32xf32>
    %17 = tpu.matmul %5, %16, %cst_15 {dimension_numbers = #tpu.dot_dimension_numbers<[1], [0], [0], [1], [0, 0, 1, 1], [], []>} : vector<8x40xf32>, vector<40x32xf32>, vector<8x32xf32> -> vector<8x32xf32>
    %18 = arith.addf %15, %17 : vector<8x32xf32>
    %c0_16 = arith.constant 0 : index
    %c0_17 = arith.constant 0 : index
    %19 = vector.load %arg9[%c0_16, %c0_17] : memref<8x32xf32, #tpu.memory_space<vmem>>, vector<8x32xf32>
    tpu.vector_store %arg9[%c0_16, %c0_17], %18 {strides = array<i32>} : memref<8x32xf32, #tpu.memory_space<vmem>>, vector<8x32xf32>,
    %c0_i32_18 = arith.constant 0 : i32
    %20 = arith.cmpi eq, %arg0, %c0_i32_18 : i32
    %21 = arith.extui %20 : i1 to i32
    %c0_i32_19 = arith.constant 0 : i32
    %22 = arith.cmpi ne, %21, %c0_i32_19 : i32
    scf.if %22 {
      %c0_20 = arith.constant 0 : index
      %c0_21 = arith.constant 0 : index
      %23 = vector.load %arg8[%c0_20, %c0_21] : memref<8x32xf32, #tpu.memory_space<vmem>>, vector<8x32xf32>
      %c0_22 = arith.constant 0 : index
      %c0_23 = arith.constant 0 : index
      %24 = vector.load %arg9[%c0_22, %c0_23] : memref<8x32xf32, #tpu.memory_space<vmem>>, vector<8x32xf32>
      %c0_24 = arith.constant 0 : index
      %c0_25 = arith.constant 0 : index
      %25 = vector.load %arg10[%c0_24, %c0_25] : memref<8x1xf32, #tpu.memory_space<vmem>>, vector<8x1xf32>
      %c0_26 = arith.constant 0 : index
      %c0_27 = arith.constant 0 : index
      %26 = vector.load %arg3[%c0_26, %c0_27] : memref<8x32xf32, #tpu.memory_space<vmem>>, vector<8x32xf32>
      %c0_28 = arith.constant 0 : index
      %c0_29 = arith.constant 0 : index
      %27 = vector.load %arg4[%c0_28, %c0_29] : memref<8x32xf32, #tpu.memory_space<vmem>>, vector<8x32xf32>
      %c0_30 = arith.constant 0 : index
      %c0_31 = arith.constant 0 : index
      %28 = vector.load %arg5[%c0_30, %c0_31] : memref<8x1xf32, #tpu.memory_space<vmem>>, vector<8x1xf32>
      %cst_32 = arith.constant 1.000000e+00 : f32
      %29 = vector.broadcast %cst_32 : f32 to vector<8x1xf32>
      %30 = arith.maximumf %25, %29 : vector<8x1xf32>
      %31 = tpu.reciprocal %30 : vector<8x1xf32> -> vector<8x1xf32>
      %32 = vector.broadcast %31 : vector<8x1xf32> to vector<8x32xf32>
      %33 = arith.mulf %23, %32 : vector<8x32xf32>
      %cst_33 = arith.constant 2.000000e+00 : f32
      %34 = vector.broadcast %cst_33 : f32 to vector<8x32xf32>
      %35 = arith.mulf %34, %33 : vector<8x32xf32>
      %36 = arith.mulf %35, %23 : vector<8x32xf32>
      %37 = arith.subf %24, %36 : vector<8x32xf32>
      %38 = arith.mulf %33, %33 : vector<8x32xf32>
      %39 = vector.broadcast %25 : vector<8x1xf32> to vector<8x32xf32>
      %40 = arith.mulf %38, %39 : vector<8x32xf32>
      %41 = arith.addf %37, %40 : vector<8x32xf32>
      %42 = vector.broadcast %31 : vector<8x1xf32> to vector<8x32xf32>
      %43 = arith.mulf %41, %42 : vector<8x32xf32>
      %44 = arith.addf %25, %28 : vector<8x1xf32>
      %cst_34 = arith.constant 0.000000e+00 : f32
      %45 = vector.broadcast %cst_34 : f32 to vector<8x1xf32>
      %46 = arith.cmpf oeq, %44, %45 : vector<8x1xf32>
      %cst_35 = arith.constant 1.000000e+00 : f32
      %47 = vector.broadcast %cst_35 : f32 to vector<8x1xf32>
      %48 = arith.select %46, %47, %44 : vector<8x1xi1>, vector<8x1xf32>
      %49 = tpu.reciprocal %48 : vector<8x1xf32> -> vector<8x1xf32>
      %50 = arith.mulf %25, %49 : vector<8x1xf32>
      %cst_36 = arith.constant 1.000000e+00 : f32
      %51 = vector.broadcast %cst_36 : f32 to vector<8x1xf32>
      %52 = arith.subf %51, %50 : vector<8x1xf32>
      %53 = arith.subf %26, %33 : vector<8x32xf32>
      %54 = vector.broadcast %52 : vector<8x1xf32> to vector<8x32xf32>
      %55 = arith.mulf %27, %54 : vector<8x32xf32>
      %56 = vector.broadcast %50 : vector<8x1xf32> to vector<8x32xf32>
      %57 = arith.mulf %43, %56 : vector<8x32xf32>
      %58 = arith.addf %55, %57 : vector<8x32xf32>
      %59 = arith.mulf %50, %52 : vector<8x1xf32>
      %60 = vector.broadcast %59 : vector<8x1xf32> to vector<8x32xf32>
      %61 = arith.mulf %60, %53 : vector<8x32xf32>
      %62 = arith.mulf %61, %53 : vector<8x32xf32>
      %63 = arith.addf %58, %62 : vector<8x32xf32>
      %64 = vector.broadcast %52 : vector<8x1xf32> to vector<8x32xf32>
      %65 = arith.mulf %26, %64 : vector<8x32xf32>
      %66 = vector.broadcast %50 : vector<8x1xf32> to vector<8x32xf32>
      %67 = arith.mulf %33, %66 : vector<8x32xf32>
      %68 = arith.addf %65, %67 : vector<8x32xf32>
      %c0_37 = arith.constant 0 : index
      %c0_38 = arith.constant 0 : index
      %69 = vector.load %arg8[%c0_37, %c0_38] : memref<8x32xf32, #tpu.memory_space<vmem>>, vector<8x32xf32>
      tpu.vector_store %arg8[%c0_37, %c0_38], %68 {strides = array<i32>} : memref<8x32xf32, #tpu.memory_space<vmem>>, vector<8x32xf32>,
      %c0_39 = arith.constant 0 : index
      %c0_40 = arith.constant 0 : index
      %70 = vector.load %arg9[%c0_39, %c0_40] : memref<8x32xf32, #tpu.memory_space<vmem>>, vector<8x32xf32>
      tpu.vector_store %arg9[%c0_39, %c0_40], %63 {strides = array<i32>} : memref<8x32xf32, #tpu.memory_space<vmem>>, vector<8x32xf32>,
      %71 = arith.addf %28, %25 : vector<8x1xf32>
      %c0_41 = arith.constant 0 : index
      %c0_42 = arith.constant 0 : index
      %72 = vector.load %arg10[%c0_41, %c0_42] : memref<8x1xf32, #tpu.memory_space<vmem>>, vector<8x1xf32>
      tpu.vector_store %arg10[%c0_41, %c0_42], %71 {strides = array<i32>} : memref<8x1xf32, #tpu.memory_space<vmem>>, vector<8x1xf32>,
      %c0_43 = arith.constant 0 : index
      %c0_44 = arith.constant 0 : index
      %73 = vector.load %arg6[%c0_43, %c0_44] : memref<8x32xf32, #tpu.memory_space<vmem>>, vector<8x32xf32>
      %74 = arith.mulf %73, %73 : vector<8x32xf32>
      %cst_45 = arith.constant dense<0.000000e+00> : vector<8x8xf32>
      %75 = tpu.matmul %63, %74, %cst_45 {dimension_numbers = #tpu.dot_dimension_numbers<[1], [1], [0], [0], [0, 0, 1, 0], [], []>} : vector<8x32xf32>, vector<8x32xf32>, vector<8x8xf32> -> vector<8x8xf32>
      %c0_46 = arith.constant 0 : index
      %c0_47 = arith.constant 0 : index
      %76 = memref.load %arg7[%c0_46, %c0_47] : memref<1x1xf32, #tpu.memory_space<smem>>
      %cst_48 = arith.constant 5.000000e-01 : f32
      %77 = arith.mulf %76, %cst_48 : f32
      %78 = vector.broadcast %77 : f32 to vector<8x8xf32>
      %79 = arith.mulf %75, %78 : vector<8x8xf32>
      %c0_49 = arith.constant 0 : index
      %c0_50 = arith.constant 0 : index
      %80 = vector.load %arg11[%c0_49, %c0_50] : memref<8x8xf32, #tpu.memory_space<vmem>>, vector<8x8xf32>
      tpu.vector_store %arg11[%c0_49, %c0_50], %79 {strides = array<i32>} : memref<8x8xf32, #tpu.memory_space<vmem>>, vector<8x8xf32>,
    } else {
    }
    return
  }
  func.func @transform_0(%arg0: i32) -> (i32, i32) {
    %c0_i32 = arith.constant 0 : i32
    %c0_i32_0 = arith.constant 0 : i32
    return %arg0, %c0_i32 : i32, i32
  }
  func.func @transform_1(%arg0: i32) -> (i32, i32) {
    %c0_i32 = arith.constant 0 : i32
    %c0_i32_0 = arith.constant 0 : i32
    return %arg0, %c0_i32 : i32, i32
  }
  func.func @transform_2(%arg0: i32) -> (i32, i32) {
    %c0_i32 = arith.constant 0 : i32
    %c0_i32_0 = arith.constant 0 : i32
    %c0_i32_1 = arith.constant 0 : i32
    return %c0_i32, %c0_i32_0 : i32, i32
  }
  func.func @transform_3(%arg0: i32) -> (i32, i32) {
    %c0_i32 = arith.constant 0 : i32
    %c0_i32_0 = arith.constant 0 : i32
    %c0_i32_1 = arith.constant 0 : i32
    return %c0_i32, %c0_i32_0 : i32, i32
  }
  func.func @transform_4(%arg0: i32) -> (i32, i32) {
    %c0_i32 = arith.constant 0 : i32
    %c0_i32_0 = arith.constant 0 : i32
    %c0_i32_1 = arith.constant 0 : i32
    return %c0_i32, %c0_i32_0 : i32, i32
  }
  func.func @transform_5(%arg0: i32) -> (i32, i32) {
    %c0_i32 = arith.constant 0 : i32
    %c0_i32_0 = arith.constant 0 : i32
    %c0_i32_1 = arith.constant 0 : i32
    return %c0_i32, %c0_i32_0 : i32, i32
  }
  func.func @transform_6(%arg0: i32) -> (i32, i32) {
    %c0_i32 = arith.constant 0 : i32
    %c0_i32_0 = arith.constant 0 : i32
    %c0_i32_1 = arith.constant 0 : i32
    return %c0_i32, %c0_i32_0 : i32, i32
  }
  func.func @transform_7(%arg0: i32) -> (i32, i32) {
    %c0_i32 = arith.constant 0 : i32
    %c0_i32_0 = arith.constant 0 : i32
    %c0_i32_1 = arith.constant 0 : i32
    return %c0_i32, %c0_i32_0 : i32, i32
  }
  func.func @transform_8(%arg0: i32) -> (i32, i32) {
    %c0_i32 = arith.constant 0 : i32
    %c0_i32_0 = arith.constant 0 : i32
    %c0_i32_1 = arith.constant 0 : i32
    return %c0_i32, %c0_i32_0 : i32, i32
  }
  func.func @transform_9(%arg0: i32) -> (i32, i32) {
    %c0_i32 = arith.constant 0 : i32
    %c0_i32_0 = arith.constant 0 : i32
    %c0_i32_1 = arith.constant 0 : i32
    return %c0_i32, %c0_i32_0 : i32, i32
  }
  func.func @transform_10(%arg0: i32) -> (i32, i32) {
    %c0_i32 = arith.constant 0 : i32
    %c0_i32_0 = arith.constant 0 : i32
    %c0_i32_1 = arith.constant 0 : i32
    return %c0_i32, %c0_i32_0 : i32, i32
  }
}

module attributes {stable_mosaic.version = 11 : i64} {
  func.func @_aug_loss_kernel(%arg0: i32, %arg1: memref<40x8xf32, #tpu.memory_space<vmem>>, %arg2: memref<40x8xf32, #tpu.memory_space<vmem>>, %arg3: memref<1x8xf32, #tpu.memory_space<vmem>>, %arg4: memref<8x8xf32, #tpu.memory_space<vmem>>, %arg5: memref<40x1xf32, #tpu.memory_space<vmem>>) attributes {dimension_semantics = [#tpu.dimension_semantics<parallel>], iteration_bounds = array<i64: 1>, scalar_prefetch = 0 : i64, scratch_operands = 0 : i64, tpu.core_type = #tpu.core_type<tc>, window_params = [{transform_indices = @transform_0, window_bounds = array<i64: 40, 8>}, {transform_indices = @transform_1, window_bounds = array<i64: 40, 8>}, {pipeline_mode = #tpu.pipeline_mode<synchronous>, transform_indices = @transform_2, window_bounds = array<i64: 1, 8>}, {pipeline_mode = #tpu.pipeline_mode<synchronous>, transform_indices = @transform_3, window_bounds = array<i64: 8, 8>}, {transform_indices = @transform_4, window_bounds = array<i64: 40, 1>}]} {
    %c0 = arith.constant 0 : index
    %c0_0 = arith.constant 0 : index
    %0 = vector.load %arg1[%c0, %c0_0] : memref<40x8xf32, #tpu.memory_space<vmem>>, vector<40x8xf32>
    %c0_1 = arith.constant 0 : index
    %c0_2 = arith.constant 0 : index
    %1 = vector.load %arg2[%c0_1, %c0_2] : memref<40x8xf32, #tpu.memory_space<vmem>>, vector<40x8xf32>
    %c0_3 = arith.constant 0 : index
    %c0_4 = arith.constant 0 : index
    %2 = vector.load %arg3[%c0_3, %c0_4] : memref<1x8xf32, #tpu.memory_space<vmem>>, vector<1x8xf32>
    %3 = vector.broadcast %2 : vector<1x8xf32> to vector<40x8xf32>
    %4 = arith.mulf %0, %3 : vector<40x8xf32>
    %cst = arith.constant dense<0.000000e+00> : vector<40xf32>
    %5 = vector.multi_reduction <add>, %4, %cst [1] : vector<40x8xf32> to vector<40xf32>
    %6 = vector.shape_cast %5 : vector<40xf32> to vector<40x1xf32>
    %cst_5 = arith.constant 1.000000e+00 : f32
    %7 = vector.broadcast %cst_5 : f32 to vector<40x1xf32>
    %8 = arith.maximumf %6, %7 : vector<40x1xf32>
    %9 = tpu.reciprocal %8 : vector<40x1xf32> -> vector<40x1xf32>
    %10 = vector.broadcast %9 : vector<40x1xf32> to vector<40x8xf32>
    %11 = arith.mulf %4, %10 : vector<40x8xf32>
    %c0_6 = arith.constant 0 : index
    %c0_7 = arith.constant 0 : index
    %12 = vector.load %arg4[%c0_6, %c0_7] : memref<8x8xf32, #tpu.memory_space<vmem>>, vector<8x8xf32>
    %cst_8 = arith.constant dense<0.000000e+00> : vector<40x8xf32>
    %13 = tpu.matmul %11, %12, %cst_8 {dimension_numbers = #tpu.dot_dimension_numbers<[1], [0], [0], [1], [0, 0, 1, 1], [], []>} : vector<40x8xf32>, vector<8x8xf32>, vector<40x8xf32> -> vector<40x8xf32>
    %cst_9 = arith.constant 2.000000e+00 : f32
    %14 = vector.broadcast %cst_9 : f32 to vector<40x8xf32>
    %15 = arith.mulf %14, %0 : vector<40x8xf32>
    %cst_10 = arith.constant 1.000000e+00 : f32
    %16 = vector.broadcast %cst_10 : f32 to vector<40x8xf32>
    %17 = arith.subf %16, %15 : vector<40x8xf32>
    %18 = arith.mulf %13, %17 : vector<40x8xf32>
    %19 = arith.addf %1, %18 : vector<40x8xf32>
    %cst_11 = arith.constant 0.000000e+00 : f32
    %20 = vector.broadcast %cst_11 : f32 to vector<40x8xf32>
    %21 = arith.maximumf %19, %20 : vector<40x8xf32>
    %22 = arith.mulf %19, %0 : vector<40x8xf32>
    %23 = arith.subf %21, %22 : vector<40x8xf32>
    %24 = math.absf %19 : vector<40x8xf32>
    %cst_12 = arith.constant 0.000000e+00 : f32
    %25 = vector.broadcast %cst_12 : f32 to vector<40x8xf32>
    %26 = arith.subf %25, %24 : vector<40x8xf32>
    %27 = math.exp %26 : vector<40x8xf32>
    %cst_13 = arith.constant 1.000000e+00 : f32
    %28 = vector.broadcast %cst_13 : f32 to vector<40x8xf32>
    %29 = arith.addf %28, %27 : vector<40x8xf32>
    %30 = math.log %29 : vector<40x8xf32>
    %31 = arith.addf %23, %30 : vector<40x8xf32>
    %cst_14 = arith.constant dense<0.000000e+00> : vector<40xf32>
    %32 = vector.multi_reduction <add>, %31, %cst_14 [1] : vector<40x8xf32> to vector<40xf32>
    %33 = vector.shape_cast %32 : vector<40xf32> to vector<40x1xf32>
    %c0_15 = arith.constant 0 : index
    %c0_16 = arith.constant 0 : index
    %34 = vector.load %arg5[%c0_15, %c0_16] : memref<40x1xf32, #tpu.memory_space<vmem>>, vector<40x1xf32>
    tpu.vector_store %arg5[%c0_15, %c0_16], %33 {strides = array<i32>} : memref<40x1xf32, #tpu.memory_space<vmem>>, vector<40x1xf32>,
    return
  }
  func.func @transform_0(%arg0: i32) -> (i32, i32) {
    %c0_i32 = arith.constant 0 : i32
    %c0_i32_0 = arith.constant 0 : i32
    return %arg0, %c0_i32 : i32, i32
  }
  func.func @transform_1(%arg0: i32) -> (i32, i32) {
    %c0_i32 = arith.constant 0 : i32
    %c0_i32_0 = arith.constant 0 : i32
    return %arg0, %c0_i32 : i32, i32
  }
  func.func @transform_2(%arg0: i32) -> (i32, i32) {
    %c0_i32 = arith.constant 0 : i32
    %c0_i32_0 = arith.constant 0 : i32
    %c0_i32_1 = arith.constant 0 : i32
    return %c0_i32, %c0_i32_0 : i32, i32
  }
  func.func @transform_3(%arg0: i32) -> (i32, i32) {
    %c0_i32 = arith.constant 0 : i32
    %c0_i32_0 = arith.constant 0 : i32
    %c0_i32_1 = arith.constant 0 : i32
    return %c0_i32, %c0_i32_0 : i32, i32
  }
  func.func @transform_4(%arg0: i32) -> (i32, i32) {
    %c0_i32 = arith.constant 0 : i32
    %c0_i32_0 = arith.constant 0 : i32
    return %arg0, %c0_i32 : i32, i32
  }
}

</mosaic_0001>

<bundles_post_ra>
// kernel: isda_bce_forward.2
= control target key start
LH: loop header
LB: loop body
LE: loop exit
PB: predicated region body
PF: predicated region fallthrough
CT: control target
= control target key end

     0   :  { %17 = vsyncpa [#allocation4], 0  ;;  %s528_s0 = inlined_call_operand.vmem [shape: f32[40,32], index: 0, kind: input, shape index: {}]   ;;  %s529_s1 = inlined_call_operand.vmem [shape: f32[40,8], index: 1, kind: input, shape index: {}]   ;;  %s530_s2 = inlined_call_operand.vmem [shape: f32[8,32], index: 2, kind: input, shape index: {}]   ;;  %s531_s3 = inlined_call_operand.vmem [shape: f32[8,32], index: 3, kind: input, shape index: {}]   ;;  %s532_s4 = inlined_call_operand.vmem [shape: f32[8,1], index: 4, kind: input, shape index: {}]   ;;  %s533_s5 = inlined_call_operand.vmem [shape: f32[8,32], index: 5, kind: input, shape index: {}]   ;;  %s534_s6 = inlined_call_operand.<no memory space> [shape: f32[1,1], index: 6, kind: input, shape index: {}]   ;;  %s535_s7 = inlined_call_operand.hbm [shape: f32[8,32], index: 7, kind: output, shape index: {0}]   ;;  %s536_s8 = inlined_call_operand.hbm [shape: f32[8,32], index: 8, kind: output, shape index: {1}]   ;;  %s537_s9 = inlined_call_operand.vmem [shape: f32[8,1], index: 9, kind: output, shape index: {2}]   ;;  %s538_s10 = inlined_call_operand.vmem [shape: f32[8,8], index: 10, kind: output, shape index: {3}]  }
   0x1   :  { %v49_v0 = vld [vmem:[%s529_s1] sm:$0xff]  ;;  %v47_v3 = vld [vmem:[%s528_s0 + $0x18] sm:$0xff]  ;;  %v46_v4 = vld [vmem:[%s528_s0 + $0x10] sm:$0xff] }
   0x2   :  { %54 = vxpose.xlu0.b32.start [1/5] (short) (narrow) %v49_v0, 8  ;;  %v48_v1 = vld [vmem:[%s528_s0 + $0x20] sm:$0xff]  ;;  %v125_v5 = vmul.f32 %v47_v3, %v47_v3  ;;  %v45_v6 = vld [vmem:[%s528_s0 + $0x8] sm:$0xff] }
   0x3   :  { %102 = vmatpush.msra.mxu0 %v48_v1  ;;  %v126_v2 = vmul.f32 %v48_v1, %v48_v1 }
   0x4   :  { %18 = vsyncpa [#allocation6], 0  ;;  %v124_v7 = vmul.f32 %v46_v4, %v46_v4  ;;  %v50_v8 = vld [vmem:[%s529_s1 + $0x8] sm:$0xff]  ;;  %v123_v9 = vmul.f32 %v45_v6, %v45_v6  ;;  %v51_v10 = vld [vmem:[%s529_s1 + $0x10] sm:$0xff]  ;;  %vm87_vm0 = vcmask 326656   ;;  %vm40_vm1 = vcmask 7168  }
   0x5   :  { %138 = vmatpush.msra.mxu1 %v126_v2  ;;  %103 = vmatpush.msra.mxu0 %v47_v3  ;;  %v52_v11 = vld [vmem:[%s529_s1 + $0x18] sm:$0xff]  ;;  %v53_v12 = vld [vmem:[%s529_s1 + $0x20] sm:$0xff]  ;;  %v380_v17 = vmov 0.0   ;;  %vm37_vm2 = vcmask 261120   ;;  %v381_v18 = vmov 0   ;;  %vm42_vm12 = vcmask 64512  }
   0x6   :  { %v44_v13 = vld [vmem:[%s528_s0] sm:$0xff]  ;;  %41 = vst.msk [vmem:[%s537_s9] sm:$0xff] %vm40_vm1, %v380_v17  ;;  %322 = vset.pattern.permute.xlu2 %v381_v18  ;;  %321 = vset.pattern.permute.xlu1 %v381_v18  ;;  %s280_s11 = sshll.u32 %s535_s7, 4  ;;  %s291_s0 = sshll.u32 %s536_s8, 4  ;;  %s281_s11 = int_to_ptr.hbm [resolvable:$true] %s280_s11  ;;  %s292_s0 = int_to_ptr.hbm [resolvable:$true] %s291_s0 }
   0x7   :  { %139 = vmatpush.msra.mxu1 %v125_v5  ;;  %104 = vmatpush.msra.mxu0 %v46_v4  ;;  %v122_v14 = vmul.f32 %v44_v13, %v44_v13  ;;  %38 = vst.msk [vmem:[#allocation3] sm:$0xff] %vm37_vm2, %v380_v17  ;;  %v157_v24 = vld [vmem:[%s532_s4] sm:$0xff]  ;;  %s268_s16 = smul.f32 0.5, %s534_s6 }
   0x8   :  { %39 = vst.msk [vmem:[#allocation5] sm:$0xff] %vm37_vm2, %v380_v17  ;;  %v239_v57 = vld [vmem:[%s533_s5] sm:$0xff] }
   0x9   :  { %140 = vmatpush.msra.mxu1 %v124_v7  ;;  %105 = vmatpush.msra.mxu0 %v45_v6  ;;  %v240_v58 = vmul.f32 %v239_v57, %v239_v57  ;;  %43 = vst.msk [vmem:[%s538_s10] sm:$0xff] %vm42_vm12, %v380_v17  ;;  %v155_v60 = vld [vmem:[%s530_s2] sm:$0xff]  ;;  %s382_s2 = smov [#allocation3]  }
   0xa   :  { %55 = vxpose.xlu0.b32.cont [2/5] (short) (narrow) %v50_v8, 8  ;;  %s278_s28 = sshll.u32 %s382_s2, 4  ;;  %s279_s28 = int_to_ptr.vmem [resolvable:$true] %s278_s28 }
   0xb   :  { %141 = vmatpush.msra.mxu1 %v123_v9  ;;  %106 = vmatpush.msra.mxu0 %v44_v13 }
   0xc   :  { %315 = vmatpush.xpose.msk.msra.mxu2 %vm37_vm2, %v240_v58 }
   0xd   :  { %142 = vmatpush.msra.mxu1 %v122_v14  ;;  %v114_v19 = vld [vmem:[%s537_s9] sm:$0xff] }
   0xe   :  { %v86_v22 = vld [vmem:[#allocation3] sm:$0xff] }
   0xf   :  { %v121_v23 = vld [vmem:[#allocation5] sm:$0xff] }
  0x12   :  { %56 = vxpose.xlu0.b32.cont [3/5] (short) (narrow) %v51_v10, 8 }
  0x1a   :  { %57 = vxpose.xlu0.b32.cont [4/5] (short) (narrow) %v52_v11, 8 }
  0x22   :  { %58 = vxpose.xlu0.b32.end [5/5] (short) (narrow) %v53_v12, 8  ;;  %v156_v12 = vld [vmem:[%s531_s3] sm:$0xff]  ;;  %s383_s3 = smov [#allocation5]  }
  0x23   :  { %s289_s12 = sshll.u32 %s383_s3, 4  ;;  %s290_s12 = int_to_ptr.vmem [resolvable:$true] %s289_s12 }
  0x89   :  { %323 = vset.pattern.permute.xlu0 %v381_v18 }
  0xa6   :  { %v70_v15 = vpop.trf.xlu0 }
  0xa7   :  { %313 = vmatmul.msk.f32.vlgmr.msra.gmra.mxu0 %vm87_vm0, %v70_v15  ;;  %314 = vmatmul.msk.f32.vlgmr.msra.gmra.mxu1 %vm87_vm0, %v70_v15  ;;  %v115_v16 = vsel %vm87_vm0, %v70_v15, 0.0 }
  0xa8   :  { %116 = vadd.xlane.f32.xlu1 %v115_v16 }
 0x11b   :  { %v117_v20 = vpop.xlane.xlu1 %116 }
 0x11c   :  { %v118_v21 = vadd.f32 %v117_v20, %v114_v19 }
 0x11e   :  { %120 = vst.msk [vmem:[%s537_s9] sm:$0xff] %vm40_vm1, %v118_v21  ;;  %v269_v21 = vstv %s268_s16 }
 0x124   :  { %v108_v25 = vpop.f32.mrf.mxu0  ;;  %v144_v26 = vpop.f32.mrf.mxu1 }
 0x125   :  { %v111_v27 = vadd.f32 %v108_v25, %v86_v22  ;;  %v147_v28 = vadd.f32 %v144_v26, %v121_v23  ;;  %v154_v29 = vld [vmem:[%s537_s9] sm:$0xff] }
 0x126   :  { %185 = vperm.xlu2 %322, %v154_v29   ;;  %v158_v30 = vmax.f32 %v154_v29, 1.0  ;;  %v191_v31 = vadd.f32 %v157_v24, %v154_v29 }
 0x127   :  { %113 = vst.msk [vmem:[#allocation3] sm:$0xff] %vm37_vm2, %v111_v27 }
 0x128   :  { %148 = vst.msk [vmem:[#allocation5] sm:$0xff] %vm37_vm2, %v147_v28  ;;  %324 = vrcp.f32 %v158_v30  ;;  %vm192_vm3 = vcmp.eq.f32.partialorder %v191_v31, 0.0  ;;  %v170_v37 = vand.u32 2147483648, %v158_v30  ;;  %v168_v40 = vand.u32 2147483647, %v158_v30 }
 0x129   :  { %238 = vst.msk [vmem:[%s537_s9] sm:$0xff] %vm40_vm1, %v191_v31  ;;  %v193_v32 = vsel %vm192_vm3, 1.0, %v191_v31  ;;  %vm164_vm5 = vweird.f32 %v158_v30 }
 0x12a   :  { %326 = vrcp.f32 %v193_v32  ;;  %v205_v43 = vand.u32 2147483648, %v193_v32  ;;  %v171_v44 = vor.u32 1.1754944e-38, %v170_v37  ;;  %v203_v46 = vand.u32 2147483647, %v193_v32 }
 0x12b   :  { %vm169_vm8 = vcmp.eq.f32.partialorder %v168_v40, 8.507059e+37  ;;  %vm199_vm9 = vweird.f32 %v193_v32 }
 0x12c   :  { %v206_v50 = vor.u32 1.1754944e-38, %v205_v43  ;;  %vm204_vm11 = vcmp.eq.f32.partialorder %v203_v46, 8.507059e+37 }
 0x12e   :  { %v325_v33 = vpop.eup %324  ;;  %v152_v63 = vld [vmem:[#allocation3] sm:$0xff] }
 0x12f   :  { %v160_v34 = vmul.f32 %v325_v33, %v158_v30  ;;  %vm165_vm4 = vweird.f32 %v325_v33  ;;  %v153_v7 = vld [vmem:[#allocation5] sm:$0xff] }
 0x130   :  { %v327_v35 = vpop.eup %326  ;;  %vm166_vm6 = vmor %vm164_vm5, %vm165_vm4 }
 0x131   :  { %v161_v36 = vsub.f32 1.0, %v160_v34  ;;  %v195_v38 = vmul.f32 %v327_v35, %v193_v32  ;;  %vm200_vm7 = vweird.f32 %v327_v35 }
 0x132   :  { %vm201_vm10 = vmor %vm199_vm9, %vm200_vm7 }
 0x133   :  { %v162_v39 = vmul.f32 %v325_v33, %v161_v36  ;;  %v196_v41 = vsub.f32 1.0, %v195_v38 }
 0x135   :  { %v163_v42 = vadd.f32 %v325_v33, %v162_v39  ;;  %v197_v45 = vmul.f32 %v327_v35, %v196_v41 }
 0x137   :  { %v167_v47 = vsel %vm166_vm6, %v325_v33, %v163_v42  ;;  %v198_v49 = vadd.f32 %v327_v35, %v197_v45 }
 0x138   :  { %v172_v48 = vsel %vm169_vm8, %v171_v44, %v167_v47 }
 0x139   :  { %175 = vperm.xlu1 %321, %v172_v48   ;;  %v202_v51 = vsel %vm201_vm10, %v327_v35, %v198_v49 }
 0x13a   :  { %v207_v52 = vsel %vm204_vm11, %v206_v50, %v202_v51 }
 0x13b   :  { %v208_v53 = vmul.f32 %v207_v52, %v154_v29 }
 0x13d   :  { %219 = vperm.xlu2 %322, %v208_v53   ;;  %v209_v54 = vsub.f32 1.0, %v208_v53 }
 0x13f   :  { %v224_v55 = vmul.f32 %v209_v54, %v208_v53 }
 0x145   :  { %213 = vperm.xlu2 %322, %v209_v54  }
 0x14d   :  { %227 = vperm.xlu2 %322, %v224_v55  }
 0x180   :  { %v186_v56 = vpop.permute.xlu2 %185 }
 0x197   :  { %v220_v59 = vpop.permute.xlu2 %219 }
 0x19f   :  { %v214_v61 = vpop.permute.xlu2 %213 }
 0x1a0   :  { %v233_v1 = vmul.f32 %v214_v61, %v155_v60  ;;  %v216_v16 = vmul.f32 %v214_v61, %v156_v12 }
 0x1a7   :  { %v228_v13 = vpop.permute.xlu2 %227 }
 0x1ab   :  { %v176_v62 = vpop.permute.xlu1 %175 }
 0x1ac   :  { %v178_v0 = vmul.f32 %v176_v62, %v152_v63 }
 0x1ae   :  { %v179_v2 = vmul.f32 2.0, %v178_v0  ;;  %v182_v3 = vmul.f32 %v178_v0, %v178_v0  ;;  %v234_v4 = vmul.f32 %v220_v59, %v178_v0  ;;  %v210_v10 = vsub.f32 %v155_v60, %v178_v0 }
 0x1b0   :  { %v180_v5 = vmul.f32 %v179_v2, %v152_v63  ;;  %v235_v6 = vadd.f32 %v234_v4, %v233_v1  ;;  %v188_v9 = vmul.f32 %v186_v56, %v182_v3  ;;  %v230_v15 = vmul.f32 %v228_v13, %v210_v10 }
 0x1b2   :  { %v181_v8 = vsub.f32 %v153_v7, %v180_v5  ;;  %236 = vst.msk [vmem:[#allocation3] sm:$0xff] %vm37_vm2, %v235_v6  ;;  %v231_v19 = vmul.f32 %v230_v15, %v210_v10 }
 0x1b3   :  { %283 = dma.vmem_to_hbm [thread:$0]  %s279_s28, 128, %s281_s11, [#allocation4]  }
 0x1b4   :  { %v189_v11 = vadd.f32 %v188_v9, %v181_v8 }
 0x1b6   :  { %v190_v14 = vmul.f32 %v189_v11, %v176_v62 }
 0x1b8   :  { %v222_v17 = vmul.f32 %v220_v59, %v190_v14 }
 0x1ba   :  { %v223_v18 = vadd.f32 %v222_v17, %v216_v16 }
 0x1bc   :  { %v232_v20 = vadd.f32 %v231_v19, %v223_v18 }
 0x1be   :  { %316 = vmatmul.msk.f32.vlgmr.msra.gmra.mxu2 %vm37_vm2, %v232_v20  ;;  %237 = vst.msk [vmem:[#allocation5] sm:$0xff] %vm37_vm2, %v232_v20 }
 0x1bf   :  { %294 = dma.vmem_to_hbm [thread:$0]  %s290_s12, 128, %s292_s0, [#allocation6]  }
 0x241   :  { %v264_v22 = vpop.f32.mrf.mxu2 }
 0x242   :  { %v270_v23 = vmul.f32 %v269_v21, %v264_v22 }
 0x244   :  { %272 = vst.msk [vmem:[%s538_s10] sm:$0xff] %vm42_vm12, %v270_v23 }
 0x245   :  { %376 = dma.done.wait [#allocation4], 128  }
 0x246   :  { %377 = vsyncadd [#allocation4], 4294967168 }
 0x247   :  { %378 = dma.done.wait [#allocation6], 128  }
 0x248   :  { %379 = vsyncadd [#allocation6], 4294967168 }
 0x249   :  { %311 = vsyncpa [#allocation4], 1 }
 0x24a   :  { %312 = vsyncpa [#allocation6], 1 }

// kernel: isda_bce_forward.3
= control target key start
LH: loop header
LB: loop body
LE: loop exit
PB: predicated region body
PF: predicated region fallthrough
CT: control target
= control target key end

     0   :  { %vm36_vm0 = vcmask 64512   ;;  %s490_s0 = inlined_call_operand.vmem [shape: f32[40,8], index: 0, kind: input, shape index: {}]   ;;  %s491_s2 = inlined_call_operand.vmem [shape: f32[1,8], index: 2, kind: input, shape index: {}]   ;;  %s492_s3 = inlined_call_operand.vmem [shape: f32[8,8], index: 3, kind: input, shape index: {}]   ;;  %s493_s1 = inlined_call_operand.vmem [shape: f32[40,8], index: 1, kind: input, shape index: {}]   ;;  %s494_s4 = inlined_call_operand.vmem [shape: f32[40,1], index: 4, kind: output, shape index: {}]  }
   0x1   :  { %v347_v0 = vld [vmem:[%s490_s0 + $0x20] sm:$0xff]  ;;  %v355_v2 = vld [vmem:[%s490_s0 + $0x10] sm:$0xff]  ;;  %v360_v3 = vld [vmem:[%s490_s0 + $0x8] sm:$0xff] }
   0x2   :  { %v288_v1 = vld [vmem:[%s491_s2] ss:$0 sm:$0xff]  ;;  %v374_v7 = vld [vmem:[%s490_s0 + $0x18] sm:$0xff] }
   0x3   :  { %v363_v4 = vmul.f32 %v288_v1, %v347_v0  ;;  %v366_v5 = vmul.f32 %v288_v1, %v355_v2  ;;  %v369_v6 = vmul.f32 %v288_v1, %v360_v3  ;;  %v379_v8 = vld [vmem:[%s490_s0] sm:$0xff]  ;;  %v388_v12 = vmul.f32 %v288_v1, %v374_v7 }
   0x4   :  { %v391_v13 = vmul.f32 %v288_v1, %v379_v8  ;;  %v132_v16 = vld [vmem:[%s492_s3] sm:$0xff]  ;;  %v183_v44 = vmul.f32 2.0, %v374_v7 }
   0x5   :  { %v49_v9 = vsel %vm36_vm0, %v363_v4, 0.0  ;;  %v43_v10 = vsel %vm36_vm0, %v366_v5, 0.0  ;;  %v40_v11 = vsel %vm36_vm0, %v369_v6, 0.0  ;;  %v46_v14 = vsel %vm36_vm0, %v388_v12, 0.0  ;;  %285 = vmatpush.msra.mxu1 %v132_v16  ;;  %286 = vmatpush.msra.mxu2 %v132_v16 }
   0x6   :  { %50 = vadd.xlane.f32.xlu1 %v49_v9  ;;  %44 = vadd.xlane.f32.xlu0 %v43_v10  ;;  %v37_v15 = vsel %vm36_vm0, %v391_v13, 0.0 }
   0x7   :  { %41 = vadd.xlane.f32.xlu2 %v40_v11  ;;  %287 = vmatpush.msra.mxu3 %v132_v16 }
   0x8   :  { %163 = vmatpush.msra.mxu0 %v132_v16 }
   0xe   :  { %47 = vadd.xlane.f32.xlu0 %v46_v14  ;;  %38 = vadd.xlane.f32.xlu1 %v37_v15 }
  0x79   :  { %v51_v17 = vpop.xlane.xlu1 %50  ;;  %v45_v18 = vpop.xlane.xlu0 %44 }
  0x7a   :  { %v56_v19 = vmax.f32 %v51_v17, 1.0  ;;  %v54_v20 = vmax.f32 %v45_v18, 1.0  ;;  %v42_v21 = vpop.xlane.xlu2 %41 }
  0x7b   :  { %v53_v22 = vmax.f32 %v42_v21, 1.0 }
  0x7c   :  { %289 = vrcp.f32 %v56_v19  ;;  %vm90_vm1 = vweird.f32 %v54_v20  ;;  %v94_v32 = vand.u32 2147483647, %v54_v20  ;;  %v96_v33 = vand.u32 2147483648, %v54_v20 }
  0x7d   :  { %291 = vrcp.f32 %v54_v20  ;;  %vm76_vm2 = vweird.f32 %v53_v22  ;;  %v80_v37 = vand.u32 2147483647, %v53_v22  ;;  %v82_v38 = vand.u32 2147483648, %v53_v22 }
  0x7e   :  { %293 = vrcp.f32 %v53_v22  ;;  %v124_v39 = vand.u32 2147483648, %v56_v19  ;;  %v122_v42 = vand.u32 2147483647, %v56_v19  ;;  %vm406_vm5 = vcmp.eq.f32.partialorder %v94_v32, 8.507059e+37 }
  0x7f   :  { %v97_v45 = vor.u32 1.1754944e-38, %v96_v33  ;;  %vm118_vm7 = vweird.f32 %v56_v19  ;;  %vm410_vm8 = vcmp.eq.f32.partialorder %v80_v37, 8.507059e+37  ;;  %v83_v50 = vor.u32 1.1754944e-38, %v82_v38 }
  0x80   :  { %v125_v52 = vor.u32 1.1754944e-38, %v124_v39  ;;  %vm123_vm11 = vcmp.eq.f32.partialorder %v122_v42, 8.507059e+37 }
  0x81   :  { %v48_v23 = vpop.xlane.xlu0 %47  ;;  %v39_v24 = vpop.xlane.xlu1 %38 }
  0x82   :  { %v290_v25 = vpop.eup %289  ;;  %v400_v26 = vmax.f32 %v48_v23, 1.0  ;;  %v402_v27 = vmax.f32 %v39_v24, 1.0 }
  0x83   :  { %v292_v28 = vpop.eup %291  ;;  %v114_v29 = vmul.f32 %v290_v25, %v56_v19  ;;  %vm119_vm3 = vweird.f32 %v290_v25 }
  0x84   :  { %v294_v30 = vpop.eup %293  ;;  %v86_v31 = vmul.f32 %v292_v28, %v54_v20  ;;  %295 = vrcp.f32 %v400_v26  ;;  %vm91_vm4 = vweird.f32 %v292_v28  ;;  %vm120_vm9 = vmor %vm118_vm7, %vm119_vm3  ;;  %v68_v60 = vand.u32 2147483648, %v402_v27 }
  0x85   :  { %v115_v34 = vsub.f32 1.0, %v114_v29  ;;  %v72_v35 = vmul.f32 %v294_v30, %v53_v22  ;;  %297 = vrcp.f32 %v402_v27  ;;  %vm77_vm6 = vweird.f32 %v294_v30  ;;  %vm92_vm10 = vmor %vm90_vm1, %vm91_vm4 }
  0x86   :  { %v87_v36 = vsub.f32 1.0, %v86_v31  ;;  %vm78_vm12 = vmor %vm76_vm2, %vm77_vm6  ;;  %v110_v14 = vand.u32 2147483648, %v400_v26  ;;  %v108_v17 = vand.u32 2147483647, %v400_v26  ;;  %vm104_vm15 = vweird.f32 %v400_v26  ;;  %v23_v31 = vld [vmem:[%s493_s1 + $0x8] sm:$0xff] }
  0x87   :  { %v73_v40 = vsub.f32 1.0, %v72_v35  ;;  %v116_v41 = vmul.f32 %v290_v25, %v115_v34  ;;  %vm62_vm1 = vweird.f32 %v402_v27  ;;  %v69_v20 = vor.u32 1.1754944e-38, %v68_v60  ;;  %v25_v60 = vld [vmem:[%s493_s1 + $0x18] sm:$0xff] }
  0x88   :  { %v88_v43 = vmul.f32 %v292_v28, %v87_v36  ;;  %vm109_vm4 = vcmp.eq.f32.partialorder %v108_v17, 8.507059e+37  ;;  %v184_v29 = vmul.f32 2.0, %v347_v0  ;;  %v26_v36 = vld [vmem:[%s493_s1 + $0x20] sm:$0xff]  ;;  %vm270_vm6 = vcmask 7168  }
  0x89   :  { %v74_v46 = vmul.f32 %v294_v30, %v73_v40  ;;  %v117_v47 = vadd.f32 %v290_v25, %v116_v41  ;;  %v24_v40 = vld [vmem:[%s493_s1 + $0x10] sm:$0xff] }
  0x8a   :  { %v296_v48 = vpop.eup %295  ;;  %v89_v51 = vadd.f32 %v292_v28, %v88_v43 }
  0x8b   :  { %v298_v53 = vpop.eup %297  ;;  %v100_v54 = vmul.f32 %v296_v48, %v400_v26  ;;  %v75_v55 = vadd.f32 %v294_v30, %v74_v46  ;;  %v121_v56 = vsel %vm120_vm9, %v290_v25, %v117_v47  ;;  %vm105_vm13 = vweird.f32 %v296_v48  ;;  %v22_v47 = vld [vmem:[%s493_s1] sm:$0xff] }
  0x8c   :  { %v58_v57 = vmul.f32 %v298_v53, %v402_v27  ;;  %v93_v58 = vsel %vm92_vm10, %v292_v28, %v89_v51  ;;  %v126_v59 = vsel %vm123_vm11, %v125_v52, %v121_v56  ;;  %vm63_vm14 = vweird.f32 %v298_v53  ;;  %vm106_vm2 = vmor %vm104_vm15, %vm105_vm13 }
  0x8d   :  { %v101_v61 = vsub.f32 1.0, %v100_v54  ;;  %v79_v62 = vsel %vm78_vm12, %v294_v30, %v75_v55  ;;  %v98_v63 = vsel %vm406_vm5, %v97_v45, %v93_v58  ;;  %v131_v1 = vmul.f32 %v126_v59, %v363_v4  ;;  %vm64_vm3 = vmor %vm62_vm1, %vm63_vm14 }
  0x8e   :  { %v59_v9 = vsub.f32 1.0, %v58_v57  ;;  %v84_v10 = vsel %vm410_vm8, %v83_v50, %v79_v62  ;;  %v129_v11 = vmul.f32 %v98_v63, %v366_v5  ;;  %v66_v4 = vand.u32 2147483647, %v402_v27 }
  0x8f   :  { %v128_v15 = vmul.f32 %v84_v10, %v369_v6  ;;  %284 = vmatmul.msk.f32.vlgmr.msra.gmra.mxu3 %vm36_vm0, %v131_v1  ;;  %v102_v16 = vmul.f32 %v296_v48, %v101_v61  ;;  %v111_v6 = vor.u32 1.1754944e-38, %v110_v14  ;;  %v181_v26 = vmul.f32 2.0, %v360_v3 }
  0x90   :  { %282 = vmatmul.msk.f32.vlgmr.msra.gmra.mxu2 %vm36_vm0, %v129_v11  ;;  %v60_v18 = vmul.f32 %v298_v53, %v59_v9  ;;  %vm67_vm5 = vcmp.eq.f32.partialorder %v66_v4, 8.507059e+37  ;;  %v182_v30 = vmul.f32 2.0, %v355_v2  ;;  %v188_v55 = vsub.f32 1.0, %v183_v44 }
  0x91   :  { %281 = vmatmul.msk.f32.vlgmr.msra.gmra.mxu1 %vm36_vm0, %v128_v15  ;;  %v103_v19 = vadd.f32 %v296_v48, %v102_v16  ;;  %v186_v27 = vsub.f32 1.0, %v181_v26 }
  0x92   :  { %v61_v5 = vadd.f32 %v298_v53, %v60_v18  ;;  %v187_v34 = vsub.f32 1.0, %v182_v30 }
  0x93   :  { %v107_v21 = vsel %vm106_vm2, %v296_v48, %v103_v19 }
  0x94   :  { %v65_v22 = vsel %vm64_vm3, %v298_v53, %v61_v5  ;;  %v112_v23 = vsel %vm109_vm4, %v111_v6, %v107_v21 }
  0x95   :  { %v70_v24 = vsel %vm67_vm5, %v69_v20, %v65_v22  ;;  %v130_v25 = vmul.f32 %v112_v23, %v388_v12  ;;  %v180_v12 = vmul.f32 2.0, %v379_v8 }
  0x96   :  { %v127_v28 = vmul.f32 %v70_v24, %v391_v13  ;;  %v189_v13 = vsub.f32 1.0, %v184_v29 }
  0x97   :  { %v185_v38 = vsub.f32 1.0, %v180_v12 }
  0x98   :  { %280 = vmatmul.msk.f32.vlgmr.msra.gmra.mxu0 %vm36_vm0, %v127_v28  ;;  %283 = vmatmul.msk.f32.gmra.mxu2 %vm36_vm0, %v130_v25 }
 0x10e   :  { %v168_v32 = vpop.f32.mrf.mxu1 }
 0x10f   :  { %v191_v33 = vmul.f32 %v186_v27, %v168_v32 }
 0x111   :  { %v196_v35 = vadd.f32 %v191_v33, %v23_v31 }
 0x112   :  { %v177_v37 = vpop.f32.mrf.mxu3 }
 0x113   :  { %v216_v39 = vand.u32 2147483647, %v196_v35  ;;  %v171_v41 = vpop.f32.mrf.mxu2  ;;  %v194_v42 = vmul.f32 %v189_v13, %v177_v37  ;;  %v201_v5 = vmax.f32 %v196_v35, 0.0  ;;  %v206_v6 = vmul.f32 %v196_v35, %v360_v3 }
 0x114   :  { %v192_v43 = vmul.f32 %v187_v34, %v171_v41 }
 0x115   :  { %v221_v45 = vsub.f32 0.0, %v216_v39  ;;  %v454_v46 = vadd.f32 %v194_v42, %v26_v36  ;;  %v165_v48 = vpop.f32.mrf.mxu0  ;;  %v211_v24 = vsub.f32 %v201_v5, %v206_v6 }
 0x116   :  { %v197_v49 = vadd.f32 %v192_v43, %v24_v40  ;;  %v190_v50 = vmul.f32 %v185_v38, %v165_v48 }
 0x117   :  { %v227_v51 = vmul.f32 1.442695, %v221_v45  ;;  %v219_v52 = vand.u32 2147483647, %v454_v46  ;;  %v204_v29 = vmax.f32 %v454_v46, 0.0  ;;  %v209_v30 = vmul.f32 %v454_v46, %v347_v0 }
 0x118   :  { %v217_v53 = vand.u32 2147483647, %v197_v49  ;;  %v195_v54 = vadd.f32 %v190_v50, %v22_v47  ;;  %v202_v28 = vmax.f32 %v197_v49, 0.0  ;;  %v207_v26 = vmul.f32 %v197_v49, %v355_v2 }
 0x119   :  { %v224_v56 = vsub.f32 0.0, %v219_v52  ;;  %299 = vpow2.f32 %v227_v51  ;;  %v214_v2 = vsub.f32 %v204_v29, %v209_v30 }
 0x11a   :  { %v222_v57 = vsub.f32 0.0, %v217_v53  ;;  %v215_v58 = vand.u32 2147483647, %v195_v54  ;;  %v200_v31 = vmax.f32 %v195_v54, 0.0  ;;  %v205_v32 = vmul.f32 %v195_v54, %v379_v8 }
 0x11b   :  { %v233_v59 = vmul.f32 1.442695, %v224_v56  ;;  %v174_v61 = vpop.f32.mrf.mxu2  ;;  %v212_v35 = vsub.f32 %v202_v28, %v207_v26 }
 0x11c   :  { %v229_v62 = vmul.f32 1.442695, %v222_v57  ;;  %v220_v63 = vsub.f32 0.0, %v215_v58  ;;  %v193_v1 = vmul.f32 %v188_v55, %v174_v61  ;;  %v210_v40 = vsub.f32 %v200_v31, %v205_v32 }
 0x11d   :  { %301 = vpow2.f32 %v233_v59 }
 0x11e   :  { %v225_v9 = vmul.f32 1.442695, %v220_v63  ;;  %v198_v10 = vadd.f32 %v193_v1, %v25_v60  ;;  %303 = vpow2.f32 %v229_v62 }
 0x11f   :  { %v300_v11 = vpop.eup %299 }
 0x120   :  { %v218_v14 = vand.u32 2147483647, %v198_v10  ;;  %v236_v15 = vadd.f32 1.0, %v300_v11  ;;  %305 = vpow2.f32 %v225_v9  ;;  %v203_v44 = vmax.f32 %v198_v10, 0.0 }
 0x121   :  { %v208_v45 = vmul.f32 %v198_v10, %v374_v7 }
 0x122   :  { %v223_v16 = vsub.f32 0.0, %v218_v14  ;;  %307 = vlog2.f32 %v236_v15 }
 0x123   :  { %v302_v17 = vpop.eup %301  ;;  %v213_v48 = vsub.f32 %v203_v44, %v208_v45 }
 0x124   :  { %v304_v18 = vpop.eup %303  ;;  %v231_v4 = vmul.f32 1.442695, %v223_v16  ;;  %v239_v19 = vadd.f32 1.0, %v302_v17 }
 0x125   :  { %v237_v20 = vadd.f32 1.0, %v304_v18 }
 0x126   :  { %v306_v21 = vpop.eup %305  ;;  %309 = vlog2.f32 %v239_v19 }
 0x127   :  { %311 = vlog2.f32 %v237_v20  ;;  %v235_v22 = vadd.f32 1.0, %v306_v21 }
 0x128   :  { %v308_v23 = vpop.eup %307  ;;  %313 = vpow2.f32 %v231_v4 }
 0x129   :  { %v243_v25 = vmul.f32 0.6931472, %v308_v23  ;;  %315 = vlog2.f32 %v235_v22 }
 0x12b   :  { %v251_v27 = vadd.f32 %v243_v25, %v211_v24 }
 0x12c   :  { %v310_v3 = vpop.eup %309 }
 0x12d   :  { %v312_v12 = vpop.eup %311  ;;  %v258_v33 = vsel %vm36_vm0, %v251_v27, 0.0  ;;  %v249_v13 = vmul.f32 0.6931472, %v310_v3 }
 0x12e   :  { %v314_v34 = vpop.eup %313  ;;  %259 = vadd.xlane.f32.xlu0 %v258_v33  ;;  %v245_v36 = vmul.f32 0.6931472, %v312_v12 }
 0x12f   :  { %v316_v37 = vpop.eup %315  ;;  %v238_v38 = vadd.f32 1.0, %v314_v34  ;;  %v254_v42 = vadd.f32 %v249_v13, %v214_v2 }
 0x130   :  { %v252_v39 = vadd.f32 %v245_v36, %v212_v35  ;;  %v241_v41 = vmul.f32 0.6931472, %v316_v37 }
 0x131   :  { %317 = vlog2.f32 %v238_v38  ;;  %v267_v46 = vsel %vm36_vm0, %v254_v42, 0.0 }
 0x132   :  { %v261_v0 = vsel %vm36_vm0, %v252_v39, 0.0  ;;  %v250_v43 = vadd.f32 %v241_v41, %v210_v40 }
 0x133   :  { %262 = vadd.xlane.f32.xlu1 %v261_v0 }
 0x134   :  { %v255_v8 = vsel %vm36_vm0, %v250_v43, 0.0 }
 0x135   :  { %256 = vadd.xlane.f32.xlu2 %v255_v8 }
 0x136   :  { %268 = vadd.xlane.f32.xlu0 %v267_v46 }
 0x137   :  { %v318_v47 = vpop.eup %317 }
 0x138   :  { %v247_v49 = vmul.f32 0.6931472, %v318_v47 }
 0x13a   :  { %v253_v50 = vadd.f32 %v247_v49, %v213_v48 }
 0x13c   :  { %v264_v51 = vsel %vm36_vm0, %v253_v50, 0.0 }
 0x13d   :  { %265 = vadd.xlane.f32.xlu2 %v264_v51 }
 0x1a1   :  { %v260_v52 = vpop.xlane.xlu0 %259 }
 0x1a2   :  { %272 = vst.msk [vmem:[%s494_s4 + $0x8] sm:$0xff] %vm270_vm6, %v260_v52 }
 0x1a6   :  { %v263_v53 = vpop.xlane.xlu1 %262 }
 0x1a7   :  { %273 = vst.msk [vmem:[%s494_s4 + $0x10] sm:$0xff] %vm270_vm6, %v263_v53 }
 0x1a8   :  { %v257_v7 = vpop.xlane.xlu2 %256 }
 0x1a9   :  { %v269_v54 = vpop.xlane.xlu0 %268  ;;  %271 = vst.msk [vmem:[%s494_s4] sm:$0xff] %vm270_vm6, %v257_v7 }
 0x1aa   :  { %275 = vst.msk [vmem:[%s494_s4 + $0x20] sm:$0xff] %vm270_vm6, %v269_v54 }
 0x1b0   :  { %v266_v55 = vpop.xlane.xlu2 %265 }
 0x1b1   :  { %274 = vst.msk [vmem:[%s494_s4 + $0x18] sm:$0xff] %vm270_vm6, %v266_v55 }

</bundles_post_ra>
